<compile_context>
chip_gen: v5e
topology: v5e:2x2
jax: 0.10.0
libtpu: 0.0.40
codegen_flags: <defaults>
</compile_context>

<pallas_src>
import jax
import jax.numpy as jnp
from jax.experimental import pallas as pl
from jax.experimental.pallas import tpu as pltpu


_LANE_WIDTHS = (8192, 4096, 2048, 1024, 512, 256, 128)
_MIN_CHUNK_BYTES = 1 << 20   # >= 1 MiB per DMA chunk
_MAX_CHUNKS = 8              # max concurrent DMAs in flight


def _sublane_pack(itemsize):
    # Rows per (sublane x lane) tile: 8 for 4-byte, 16 for 2-byte, 32 for 1-byte.
    return 8 * max(1, 4 // max(1, itemsize))


def _row_chunks(rows, lane, itemsize):
    """Static (start, nrows) chunks; several large chunks keep DMA engines busy."""
    total_bytes = rows * lane * itemsize
    pack = _sublane_pack(itemsize)
    if rows <= pack or total_bytes <= 2 * _MIN_CHUNK_BYTES:
        return [(0, rows)]
    n = int(min(_MAX_CHUNKS, total_bytes // _MIN_CHUNK_BYTES))
    per = -(-rows // n)            # ceil(rows / n)
    per = -(-per // pack) * pack   # round up to sublane-pack multiple (tile aligned)
    chunks = []
    start = 0
    while start < rows:
        sz = min(per, rows - start)   # last chunk may be ragged (sub-tile DMA is fine)
        chunks.append((start, sz))
        start += sz
    return chunks


def _make_identity_kernel(chunks, full_rows):
    """HBM->HBM DMA copy kernel with static (trace-time) chunk boundaries."""
    def kernel(x_hbm, o_hbm, sems):
        copies = []
        for i, (start, rows) in enumerate(chunks):
            if start == 0 and rows == full_rows:
                src, dst = x_hbm, o_hbm                 # whole-array DMA
            else:
                src = x_hbm.at[pl.ds(start, rows)]      # static slice: zero cost
                dst = o_hbm.at[pl.ds(start, rows)]
            cp = pltpu.make_async_copy(src, dst, sems.at[i])
            cp.start()
            copies.append(cp)
        for cp in copies:                               # all in flight, then drain
            cp.wait()
    return kernel


def identity(x: jnp.ndarray) -> jnp.ndarray:
    """Identity forward pass: returns the input unchanged (same shape/dtype)."""
    orig_shape = x.shape
    if x.size == 0:
        return x  # nothing to move; avoid a degenerate kernel launch

    size = x.size
    lane = next((l for l in _LANE_WIDTHS if size % l == 0), None)
    if lane is not None:
        x2 = x.reshape(size // lane, lane)   # lane-dense 2D slab, chunk over rows
        chunks = _row_chunks(x2.shape[0], lane, x2.dtype.itemsize)
    else:
        x2 = x.reshape(size)                 # fallback: one whole-array 1D DMA
        chunks = [(0, size)]

    out2 = pl.pallas_call(
        _make_identity_kernel(chunks, x2.shape[0]),
        out_shape=jax.ShapeDtypeStruct(x2.shape, x2.dtype),
        in_specs=[pl.BlockSpec(memory_space=pl.ANY)],   # stay in HBM, no auto-DMA
        out_specs=pl.BlockSpec(memory_space=pl.ANY),
        scratch_shapes=[pltpu.SemaphoreType.DMA((len(chunks),))],
    )(x2)

    return out2.reshape(orig_shape)


if __name__ == "__main__":
    k1, k2 = jax.random.split(jax.random.PRNGKey(0))

    # Module-shaped input: NCHW feature map (batch=2, channels=4, 16x16).
    x = jax.random.normal(k1, (2, 4, 16, 16), dtype=jnp.float32)
    y = identity(x)
    jax.block_until_ready(y)
    assert y.shape == x.shape, (y.shape, x.shape)
    assert y.dtype == x.dtype, (y.dtype, x.dtype)
    assert bool(jnp.all(y == x)), "identity output mismatch"

    # Also exercise the multi-chunk concurrent-DMA path (4 MiB -> 4 x 1 MiB chunks).
    x_big = jax.random.normal(k2, (512, 2048), dtype=jnp.float32)
    y_big = identity(x_big)
    jax.block_until_ready(y_big)
    assert bool(jnp.all(y_big == x_big)), "identity (chunked) output mismatch"

    print("KERNEL_OK")
</pallas_src>

<mosaic_0001>
module attributes {stable_mosaic.version = 11 : i64} {
  func.func @kernel(%arg0: memref<1x2048xf32, #tpu.memory_space<any>>, %arg1: memref<1x2048xf32, #tpu.memory_space<any>>, %arg2: memref<1x!tpu.dma_semaphore, #tpu.memory_space<semaphore_mem>>) attributes {dimension_semantics = [], scalar_prefetch = 0 : i64, scratch_operands = 1 : i64, tpu.core_type = #tpu.core_type<tc>} {
    %c0_i32 = arith.constant 0 : i32
    %0 = tpu.memref_slice %arg2[%c0_i32] : memref<1x!tpu.dma_semaphore, #tpu.memory_space<semaphore_mem>> -> memref<1x!tpu.dma_semaphore, #tpu.memory_space<semaphore_mem>>
    %1 = tpu.memref_squeeze %0 : memref<1x!tpu.dma_semaphore, #tpu.memory_space<semaphore_mem>> -> memref<!tpu.dma_semaphore, #tpu.memory_space<semaphore_mem>>
    tpu.enqueue_dma source(%arg0 : memref<1x2048xf32, #tpu.memory_space<any>>) target(%arg1 : memref<1x2048xf32, #tpu.memory_space<any>>) target_semaphore(%1 : memref<!tpu.dma_semaphore, #tpu.memory_space<semaphore_mem>>)
    %c0_i32_0 = arith.constant 0 : i32
    %2 = tpu.memref_slice %arg2[%c0_i32_0] : memref<1x!tpu.dma_semaphore, #tpu.memory_space<semaphore_mem>> -> memref<1x!tpu.dma_semaphore, #tpu.memory_space<semaphore_mem>>
    %3 = tpu.memref_squeeze %2 : memref<1x!tpu.dma_semaphore, #tpu.memory_space<semaphore_mem>> -> memref<!tpu.dma_semaphore, #tpu.memory_space<semaphore_mem>>
    tpu.wait_dma2 semaphore(%3 : memref<!tpu.dma_semaphore, #tpu.memory_space<semaphore_mem>>) src(%arg0 : memref<1x2048xf32, #tpu.memory_space<any>>) dst(%arg1 : memref<1x2048xf32, #tpu.memory_space<any>>)
    return
  }
}

</mosaic_0001>

<bundles_post_ra>
// kernel: tpu_custom_call.1
= control target key start
LH: loop header
LB: loop body
LE: loop exit
PB: predicated region body
PF: predicated region fallthrough
CT: control target
= control target key end

     0   :  { %s32_s12 = smov [#allocation2]   ;;  %s33_s13 = smov [#allocation3]   ;;  %s51_s0 = inlined_call_operand.hbm [shape: f32[1,2048], index: 0, kind: input, shape index: {}]   ;;  %s52_s1 = inlined_call_operand.hbm [shape: f32[1,2048], index: 1, kind: output, shape index: {}]  }
   0x1   :  { %s10_s8 = sshll.u32 %s51_s0, 4  ;;  %s12_s11 = sshll.u32 %s52_s1, 4  ;;  %s11_s8 = int_to_ptr.hbm [resolvable:$true] %s10_s8  ;;  %s13_s11 = int_to_ptr.hbm [resolvable:$true] %s12_s11 }
   0x2   :  { %s34_s14 = smov 0  }
   0x3   :  { %16 = dma.general %s11_s8, 256, %s13_s11, %s32_s12, %s33_s13, [#allocation4], %s34_s14, 0  }
   0x4   :  { %30 = dma.done.wait [#allocation2], 256 }
   0x5   :  { %31 = vsyncadd [#allocation2], 4294967040 }
   0x6   :  { %20 = vsyncmov [#allocation2] }
   0x9   :  { %s21_s15 = vpop.sfrf %20 }
   0xa   :  { %p26_p0 = scmp.ne.s32.totalorder %s21_s15, 0 }
   0xc   :  { %25 = shalt.err (%p26_p0)  }

</bundles_post_ra>
